<compile_context>
chip_gen: v6e
topology: v6e:2x2x1
jax: 0.10.0
libtpu: 0.0.40
codegen_flags: <defaults>
</compile_context>

<pallas_src>
import functools

import jax
import jax.numpy as jnp
from jax.experimental import pallas as pl
from jax.experimental.pallas import tpu as pltpu

# ----------------------------- config ---------------------------------------
HIDDEN = 768           # fixed by the module (cls = Linear(768, 2))
NUM_LAYERS = 2         # small synthetic BERT
NUM_HEADS = 12
HEAD_DIM = HIDDEN // NUM_HEADS
PAIR_W = 2 * HEAD_DIM              # 128 lanes = one head pair
INTERMEDIATE = 3072
VOCAB = 1000
MAX_POS = 64
LN_EPS = 1e-12
CLS_PAD = 128                      # pad the 2-logit head to a lane-dense 128 columns

# Generation-aware VMEM limit (v7x has only 64 MiB/TC; leave headroom for double-buffering).
try:
    _cap = getattr(pltpu.get_tpu_info(), "vmem_capacity_bytes", None) or (64 * 1024 * 1024)
except Exception:  # pragma: no cover - defensive; keep the script runnable everywhere
    _cap = 64 * 1024 * 1024
_VMEM_LIMIT = int(min(_cap * 3 // 4, 96 * 1024 * 1024))


def _cparams(dim_sems):
    return pltpu.CompilerParams(dimension_semantics=dim_sems,
                                vmem_limit_bytes=_VMEM_LIMIT)


_M_TILES = (512, 256, 128, 64, 32, 16, 8)
_K_TILES = (1024, 768, 512, 256)


def _pick_tile(dim, candidates):
    """Largest candidate tile that evenly divides `dim`, else the full dim."""
    for c in candidates:
        if dim >= c and dim % c == 0:
            return c
    return dim


def _pick_m_tile(m):
    """M tile; prefer >=2 blocks along the parallel M axis (v7x has 2 TensorCores)."""
    t = _pick_tile(m, _M_TILES)
    if t == m and m >= 16 and (m // 2) % 8 == 0:
        t = m // 2
    return t


# ----------------------------- kernels --------------------------------------
def _gelu(x):
    # TODO(synk): PyTorch BERT uses the erf-based GELU; tanh approx used here (EUP-friendly).
    return 0.5 * x * (1.0 + jnp.tanh(0.7978845608028654 * (x + 0.044715 * x * x * x)))


def _layernorm_kernel(x_ref, g_ref, b_ref, o_ref, *, eps):
    x = x_ref[...].astype(jnp.float32)
    mu = jnp.mean(x, axis=-1, keepdims=True)
    var = jnp.mean(jnp.square(x - mu), axis=-1, keepdims=True)
    y = (x - mu) * jax.lax.rsqrt(var + eps)
    o_ref[...] = (y * g_ref[...] + b_ref[...]).astype(o_ref.dtype)


def _linear_kernel(x_ref, w_ref, b_ref, o_ref, *, activation):
    # bf16 MXU inputs (x already bf16), f32 accumulation.
    y = jnp.dot(x_ref[...], w_ref[...], preferred_element_type=jnp.float32)
    y = y + b_ref[...]
    if activation == "gelu":
        y = _gelu(y)
    o_ref[...] = y.astype(o_ref.dtype)


def _linear_add_ln_kernel(x_ref, w_ref, b_ref, res_ref, g_ref, be_ref, o_ref, *, eps):
    # fused: (x @ w + b) + residual -> LayerNorm (stats in f32).
    y = jnp.dot(x_ref[...], w_ref[...], preferred_element_type=jnp.float32)
    y = y + b_ref[...] + res_ref[...].astype(jnp.float32)
    mu = jnp.mean(y, axis=-1, keepdims=True)
    var = jnp.mean(jnp.square(y - mu), axis=-1, keepdims=True)
    yn = (y - mu) * jax.lax.rsqrt(var + eps)
    o_ref[...] = (yn * g_ref[...] + be_ref[...]).astype(o_ref.dtype)


def _ffn_kernel(x_ref, wi_ref, bi_ref, wo2_ref, bo2_ref, res_ref, g_ref, be_ref,
                o_ref, acc_ref, *, eps):
    # Fused FFN: gelu(x @ wi + bi) @ wo2, streamed over INTERMEDIATE chunks (grid axis 1),
    # then + bo2 + residual -> LayerNorm on the last chunk.  The [M, 3072] intermediate
    # never touches HBM.
    k = pl.program_id(1)

    @pl.when(k == 0)
    def _():
        acc_ref[...] = jnp.zeros_like(acc_ref)

    h = jnp.dot(x_ref[...], wi_ref[...], preferred_element_type=jnp.float32)
    h = _gelu(h + bi_ref[...])
    acc_ref[...] += jnp.dot(h.astype(jnp.bfloat16), wo2_ref[...],
                            preferred_element_type=jnp.float32)

    @pl.when(k == pl.num_programs(1) - 1)
    def _():
        y = acc_ref[...] + bo2_ref[...] + res_ref[...].astype(jnp.float32)
        mu = jnp.mean(y, axis=-1, keepdims=True)
        var = jnp.mean(jnp.square(y - mu), axis=-1, keepdims=True)
        yn = (y - mu) * jax.lax.rsqrt(var + eps)
        o_ref[...] = (yn * g_ref[...] + be_ref[...]).astype(o_ref.dtype)


def _attention_kernel(qkv_ref, mask_ref, o_ref, *, head_dim, num_heads):
    # One batch element per grid step; all 6 head pairs unrolled inside.
    # qkv_ref: [1, S, 3*HIDDEN] bf16, head-pair-contiguous layout [Qp|Kp|Vp] (384 lanes/pair),
    #          with 1/sqrt(head_dim) already folded into the Q projection weights.
    # mask_ref: [1, 1, S] additive f32; broadcasts over query rows in-register.
    # Output written straight into the merged-heads [1, S, HIDDEN] layout (128-lane stores).
    # TODO(synk): for long sequences, tile flash-style over (q_tile, kv_tile) with
    # online softmax instead of materializing the full [S, S] scores.
    qkv = qkv_ref[0]                  # [S, 3*HIDDEN] bf16
    m = mask_ref[0]                   # [1, S] f32
    pair_w = 2 * head_dim
    for p in range(num_heads // 2):
        base = p * 3 * pair_w
        q = qkv[:, base:base + pair_w]                      # [S, 128] (two heads)
        kk = qkv[:, base + pair_w:base + 2 * pair_w]
        v = qkv[:, base + 2 * pair_w:base + 3 * pair_w]
        pair_out = []
        for h in range(2):
            lo, hi = h * head_dim, (h + 1) * head_dim
            s = jax.lax.dot_general(q[:, lo:hi], kk[:, lo:hi], (((1,), (1,)), ((), ())),
                                    preferred_element_type=jnp.float32)   # [S, S]
            s = s + m
            s = s - jnp.max(s, axis=-1, keepdims=True)
            pr = jnp.exp(s)
            pr = pr * pl.reciprocal(jnp.sum(pr, axis=-1, keepdims=True), approx=True)
            pair_out.append(jnp.dot(pr.astype(jnp.bfloat16), v[:, lo:hi],
                                    preferred_element_type=jnp.float32))
        o_ref[0, :, p * pair_w:(p + 1) * pair_w] = (
            jnp.concatenate(pair_out, axis=-1).astype(o_ref.dtype))


# ----------------------------- wrappers -------------------------------------
def layernorm(x, gamma, beta, out_dtype=jnp.bfloat16):
    m, n = x.shape
    tm = _pick_m_tile(m)
    kern = functools.partial(_layernorm_kernel, eps=LN_EPS)
    return pl.pallas_call(
        kern,
        grid=(m // tm,),
        in_specs=[
            pl.BlockSpec((tm, n), lambda i: (i, 0)),
            pl.BlockSpec((1, n), lambda i: (0, 0)),
            pl.BlockSpec((1, n), lambda i: (0, 0)),
        ],
        out_specs=pl.BlockSpec((tm, n), lambda i: (i, 0)),
        out_shape=jax.ShapeDtypeStruct((m, n), out_dtype),
        compiler_params=_cparams(("parallel",)),
    )(x, gamma, beta)


def linear(x, w, b, activation=None, out_dtype=jnp.bfloat16):
    """Weight-resident linear: grid over M only, full bf16 weight stays in VMEM."""
    m, k = x.shape
    n = w.shape[1]
    tm = _pick_m_tile(m)
    kern = functools.partial(_linear_kernel, activation=activation)
    return pl.pallas_call(
        kern,
        grid=(m // tm,),
        in_specs=[
            pl.BlockSpec((tm, k), lambda i: (i, 0)),
            pl.BlockSpec((k, n), lambda i: (0, 0)),   # resident across the grid
            pl.BlockSpec((1, n), lambda i: (0, 0)),
        ],
        out_specs=pl.BlockSpec((tm, n), lambda i: (i, 0)),
        out_shape=jax.ShapeDtypeStruct((m, n), out_dtype),
        compiler_params=_cparams(("parallel",)),
    )(x, w, b)


def linear_add_layernorm(x, w, b, res, gamma, beta, out_dtype=jnp.bfloat16):
    m, k = x.shape
    n = w.shape[1]
    tm = _pick_m_tile(m)
    kern = functools.partial(_linear_add_ln_kernel, eps=LN_EPS)
    return pl.pallas_call(
        kern,
        grid=(m // tm,),
        in_specs=[
            pl.BlockSpec((tm, k), lambda i: (i, 0)),
            pl.BlockSpec((k, n), lambda i: (0, 0)),
            pl.BlockSpec((1, n), lambda i: (0, 0)),
            pl.BlockSpec((tm, n), lambda i: (i, 0)),
            pl.BlockSpec((1, n), lambda i: (0, 0)),
            pl.BlockSpec((1, n), lambda i: (0, 0)),
        ],
        out_specs=pl.BlockSpec((tm, n), lambda i: (i, 0)),
        out_shape=jax.ShapeDtypeStruct((m, n), out_dtype),
        compiler_params=_cparams(("parallel",)),
    )(x, w, b, res, gamma, beta)


def ffn_fused(x, wi, bi, wo2, bo2, res, gamma, beta, out_dtype=jnp.bfloat16):
    """gelu(x @ wi + bi) @ wo2 + bo2 + res -> LN, with INTERMEDIATE streamed in chunks."""
    m, h = x.shape
    inter = wi.shape[1]
    tm = _pick_m_tile(m)
    tk = _pick_tile(inter, _K_TILES)
    kern = functools.partial(_ffn_kernel, eps=LN_EPS)
    return pl.pallas_call(
        kern,
        grid=(m // tm, inter // tk),
        in_specs=[
            pl.BlockSpec((tm, h), lambda i, k: (i, 0)),     # x tile (resident across k)
            pl.BlockSpec((h, tk), lambda i, k: (0, k)),     # wi chunk
            pl.BlockSpec((1, tk), lambda i, k: (0, k)),     # bi chunk
            pl.BlockSpec((tk, h), lambda i, k: (k, 0)),     # wo2 chunk
            pl.BlockSpec((1, h), lambda i, k: (0, 0)),      # bo2
            pl.BlockSpec((tm, h), lambda i, k: (i, 0)),     # residual tile
            pl.BlockSpec((1, h), lambda i, k: (0, 0)),      # ln gamma
            pl.BlockSpec((1, h), lambda i, k: (0, 0)),      # ln beta
        ],
        out_specs=pl.BlockSpec((tm, h), lambda i, k: (i, 0)),
        out_shape=jax.ShapeDtypeStruct((m, h), out_dtype),
        scratch_shapes=[pltpu.VMEM((tm, h), jnp.float32)],
        compiler_params=_cparams(("parallel", "arbitrary")),
    )(x, wi, bi, wo2, bo2, res, gamma, beta)


def attention(qkv, add_mask):
    """qkv: [B, S, 3*HIDDEN] bf16 (head-pair-contiguous Qp|Kp|Vp layout),
    add_mask: [B, 1, S] additive float.  Returns context [B, S, HIDDEN] (heads merged)."""
    bsz, s, _ = qkv.shape
    kern = functools.partial(_attention_kernel, head_dim=HEAD_DIM, num_heads=NUM_HEADS)
    return pl.pallas_call(
        kern,
        grid=(bsz,),
        in_specs=[
            pl.BlockSpec((1, s, 3 * HIDDEN), lambda b: (b, 0, 0)),   # full per-batch QKV slab
            pl.BlockSpec((1, 1, s), lambda b: (b, 0, 0)),            # additive mask
        ],
        out_specs=pl.BlockSpec((1, s, HIDDEN), lambda b: (b, 0, 0)),
        out_shape=jax.ShapeDtypeStruct((bsz, s, HIDDEN), jnp.bfloat16),
        compiler_params=_cparams(("parallel",)),
    )(qkv, add_mask)


# ----------------------------- params ---------------------------------------
def init_params(key):
    keys = iter(jax.random.split(key, 64))

    def normal(shape, std=0.02):
        return jax.random.normal(next(keys), shape, jnp.float32) * std

    def zeros(shape):
        return jnp.zeros(shape, jnp.float32)

    def ones(shape):
        return jnp.ones(shape, jnp.float32)

    # Column scale that folds 1/sqrt(head_dim) into the Q projection of the
    # head-pair-contiguous [Qp|Kp|Vp] fused-QKV layout (384 lanes per pair).
    col = jnp.arange(3 * HIDDEN)
    is_q_col = (col % (3 * PAIR_W)) < PAIR_W
    q_scale = jnp.where(is_q_col, 1.0 / (HEAD_DIM ** 0.5), 1.0)[None, :]

    params = {
        "word_emb": normal((VOCAB, HIDDEN)),
        "pos_emb": normal((MAX_POS, HIDDEN)),
        "type_emb": normal((2, HIDDEN)),
        "emb_ln_g": ones((1, HIDDEN)),
        "emb_ln_b": zeros((1, HIDDEN)),
        "layers": [],
    }

    # classifier head: nn.init.normal_(weight, std=0.02); nn.init.normal_(bias, 0) -> std=1
    cls_w = normal((HIDDEN, 2), std=0.02)
    cls_b = jax.random.normal(next(keys), (2,), jnp.float32)
    params["cls_w"] = (jnp.zeros((HIDDEN, CLS_PAD), jnp.float32)
                       .at[:, :2].set(cls_w)).astype(jnp.bfloat16)   # lane-dense padded head
    params["cls_b"] = jnp.zeros((1, CLS_PAD), jnp.float32).at[0, :2].set(cls_b)

    for _ in range(NUM_LAYERS):
        params["layers"].append({
            # fused QKV projection, head-pair-contiguous layout, 1/sqrt(d) pre-folded into Q
            "w_qkv": (normal((HIDDEN, 3 * HIDDEN)) * q_scale).astype(jnp.bfloat16),
            "b_qkv": zeros((1, 3 * HIDDEN)),
            "wo": normal((HIDDEN, HIDDEN)).astype(jnp.bfloat16), "bo": zeros((1, HIDDEN)),
            "ln1_g": ones((1, HIDDEN)), "ln1_b": zeros((1, HIDDEN)),
            "wi": normal((HIDDEN, INTERMEDIATE)).astype(jnp.bfloat16),
            "bi": zeros((1, INTERMEDIATE)),
            "wo2": normal((INTERMEDIATE, HIDDEN)).astype(jnp.bfloat16),
            "bo2": zeros((1, HIDDEN)),
            "ln2_g": ones((1, HIDDEN)), "ln2_b": zeros((1, HIDDEN)),
        })
    return params


# ----------------------------- forward --------------------------------------
def bert_training_forward(params, input_ids, token_type_ids, attention_mask):
    """Equivalent of BertTraining.forward(..., output_all_encoded_layers=False,
    attention_show_flg=False): returns logits [B, 2]."""
    B, S = input_ids.shape

    # --- embeddings (gathers are glue; LayerNorm in Pallas, output bf16) ---
    we = jnp.take(params["word_emb"], input_ids, axis=0)          # [B,S,H]
    pe = params["pos_emb"][:S][None, :, :]                        # [1,S,H]
    te = jnp.take(params["type_emb"], token_type_ids, axis=0)     # [B,S,H]
    x = (we + pe + te).reshape(B * S, HIDDEN)
    # TODO(synk): embedding/attention/hidden dropout omitted (stochastic; identity at eval)
    x = layernorm(x, params["emb_ln_g"], params["emb_ln_b"])      # bf16 [B*S, H]

    # additive attention mask, kept small ([B,1,S]); broadcast happens in-kernel
    add_mask = ((1.0 - attention_mask.astype(jnp.float32)) * -10000.0)[:, None, :]

    # --- transformer layers (all activations bf16 between kernels) ---
    for lyr in params["layers"]:
        qkv = linear(x, lyr["w_qkv"], lyr["b_qkv"]).reshape(B, S, 3 * HIDDEN)
        ctx = attention(qkv, add_mask).reshape(B * S, HIDDEN)
        x = linear_add_layernorm(ctx, lyr["wo"], lyr["bo"], x,
                                 lyr["ln1_g"], lyr["ln1_b"])
        x = ffn_fused(x, lyr["wi"], lyr["bi"], lyr["wo2"], lyr["bo2"], x,
                      lyr["ln2_g"], lyr["ln2_b"])

    encoded = x.reshape(B, S, HIDDEN)   # last encoded layer

    # --- BertTraining head: vec_0 = encoded[:, 0, :]; out = cls(vec_0) ---
    vec0 = encoded[:, 0, :]             # [B, H] bf16 slice in glue (no full-encoded DMA)
    logits = linear(vec0, params["cls_w"], params["cls_b"], out_dtype=jnp.float32)
    return logits[:, :2]                # un-pad the lane-dense head


# ----------------------------- main ------------------------------------------
if __name__ == "__main__":
    key = jax.random.PRNGKey(0)
    pkey, ikey = jax.random.split(key)

    params = init_params(pkey)

    B, S = 2, 8
    input_ids = jax.random.randint(ikey, (B, S), 0, VOCAB, dtype=jnp.int32)
    token_type_ids = jnp.zeros((B, S), dtype=jnp.int32)
    attention_mask = jnp.ones((B, S), dtype=jnp.int32)

    logits = bert_training_forward(params, input_ids, token_type_ids, attention_mask)
    logits = jax.block_until_ready(logits)
    assert logits.shape == (B, 2) and logits.dtype == jnp.float32
    print("KERNEL_OK")
</pallas_src>

<mosaic_0001>
module attributes {stable_mosaic.version = 11 : i64} {
  func.func @_layernorm_kernel(%arg0: i32, %arg1: memref<8x768xf32, #tpu.memory_space<vmem>>, %arg2: memref<1x768xf32, #tpu.memory_space<vmem>>, %arg3: memref<1x768xf32, #tpu.memory_space<vmem>>, %arg4: memref<8x768xbf16, #tpu.memory_space<vmem>>) attributes {dimension_semantics = [#tpu.dimension_semantics<parallel>], iteration_bounds = array<i64: 2>, scalar_prefetch = 0 : i64, scratch_operands = 0 : i64, tpu.core_type = #tpu.core_type<tc>, window_params = [{transform_indices = @transform_0, window_bounds = array<i64: 8, 768>}, {pipeline_mode = #tpu.pipeline_mode<synchronous>, transform_indices = @transform_1, window_bounds = array<i64: 1, 768>}, {pipeline_mode = #tpu.pipeline_mode<synchronous>, transform_indices = @transform_2, window_bounds = array<i64: 1, 768>}, {transform_indices = @transform_3, window_bounds = array<i64: 8, 768>}]} {
    %c0 = arith.constant 0 : index
    %c0_0 = arith.constant 0 : index
    %0 = vector.load %arg1[%c0, %c0_0] : memref<8x768xf32, #tpu.memory_space<vmem>>, vector<8x768xf32>
    %cst = arith.constant dense<0.000000e+00> : vector<8xf32>
    %1 = vector.multi_reduction <add>, %0, %cst [1] : vector<8x768xf32> to vector<8xf32>
    %2 = vector.shape_cast %1 : vector<8xf32> to vector<8x1xf32>
    %cst_1 = arith.constant 7.680000e+02 : f32
    %3 = vector.broadcast %cst_1 : f32 to vector<8x1xf32>
    %4 = arith.divf %2, %3 : vector<8x1xf32>
    %5 = vector.broadcast %4 : vector<8x1xf32> to vector<8x768xf32>
    %6 = arith.subf %0, %5 : vector<8x768xf32>
    %7 = arith.mulf %6, %6 : vector<8x768xf32>
    %cst_2 = arith.constant dense<0.000000e+00> : vector<8xf32>
    %8 = vector.multi_reduction <add>, %7, %cst_2 [1] : vector<8x768xf32> to vector<8xf32>
    %9 = vector.shape_cast %8 : vector<8xf32> to vector<8x1xf32>
    %cst_3 = arith.constant 7.680000e+02 : f32
    %10 = vector.broadcast %cst_3 : f32 to vector<8x1xf32>
    %11 = arith.divf %9, %10 : vector<8x1xf32>
    %12 = vector.broadcast %4 : vector<8x1xf32> to vector<8x768xf32>
    %13 = arith.subf %0, %12 : vector<8x768xf32>
    %cst_4 = arith.constant 9.99999996E-13 : f32
    %14 = vector.broadcast %cst_4 : f32 to vector<8x1xf32>
    %15 = arith.addf %11, %14 : vector<8x1xf32>
    %16 = math.rsqrt %15 : vector<8x1xf32>
    %17 = vector.broadcast %16 : vector<8x1xf32> to vector<8x768xf32>
    %18 = arith.mulf %13, %17 : vector<8x768xf32>
    %c0_5 = arith.constant 0 : index
    %c0_6 = arith.constant 0 : index
    %19 = vector.load %arg2[%c0_5, %c0_6] : memref<1x768xf32, #tpu.memory_space<vmem>>, vector<1x768xf32>
    %20 = vector.broadcast %19 : vector<1x768xf32> to vector<8x768xf32>
    %21 = arith.mulf %18, %20 : vector<8x768xf32>
    %c0_7 = arith.constant 0 : index
    %c0_8 = arith.constant 0 : index
    %22 = vector.load %arg3[%c0_7, %c0_8] : memref<1x768xf32, #tpu.memory_space<vmem>>, vector<1x768xf32>
    %23 = vector.broadcast %22 : vector<1x768xf32> to vector<8x768xf32>
    %24 = arith.addf %21, %23 : vector<8x768xf32>
    %25 = arith.truncf %24 : vector<8x768xf32> to vector<8x768xbf16>
    %c0_9 = arith.constant 0 : index
    %c0_10 = arith.constant 0 : index
    %26 = vector.load %arg4[%c0_9, %c0_10] : memref<8x768xbf16, #tpu.memory_space<vmem>>, vector<8x768xbf16>
    tpu.vector_store %arg4[%c0_9, %c0_10], %25 {strides = array<i32>} : memref<8x768xbf16, #tpu.memory_space<vmem>>, vector<8x768xbf16>,
    return
  }
  func.func @transform_0(%arg0: i32) -> (i32, i32) {
    %c0_i32 = arith.constant 0 : i32
    %c0_i32_0 = arith.constant 0 : i32
    return %arg0, %c0_i32 : i32, i32
  }
  func.func @transform_1(%arg0: i32) -> (i32, i32) {
    %c0_i32 = arith.constant 0 : i32
    %c0_i32_0 = arith.constant 0 : i32
    %c0_i32_1 = arith.constant 0 : i32
    return %c0_i32, %c0_i32_0 : i32, i32
  }
  func.func @transform_2(%arg0: i32) -> (i32, i32) {
    %c0_i32 = arith.constant 0 : i32
    %c0_i32_0 = arith.constant 0 : i32
    %c0_i32_1 = arith.constant 0 : i32
    return %c0_i32, %c0_i32_0 : i32, i32
  }
  func.func @transform_3(%arg0: i32) -> (i32, i32) {
    %c0_i32 = arith.constant 0 : i32
    %c0_i32_0 = arith.constant 0 : i32
    return %arg0, %c0_i32 : i32, i32
  }
}

</mosaic_0001>

<bundles_post_ra>
// kernel: tpu_custom_call.1
= control target key start
LH: loop header
LB: loop body
LE: loop exit
PB: predicated region body
PF: predicated region fallthrough
CT: control target
= control target key end

     0   :  { %8 = vsyncpa [#allocation3], 0  ;;  %s908_s0 = inlined_call_operand.hbm [shape: f32[16,768], index: 0, kind: input, shape index: {}]   ;;  %s909_s1 = inlined_call_operand.hbm [shape: f32[1,768], index: 1, kind: input, shape index: {}]   ;;  %s910_s2 = inlined_call_operand.hbm [shape: f32[1,768], index: 2, kind: input, shape index: {}]   ;;  %s911_s3 = inlined_call_operand.hbm [shape: bf16[16,768], index: 3, kind: output, shape index: {}]  }
   0x1   :  { %10 = vsyncpa [#allocation3 + $0x1], 0 }
   0x2   :  { %11 = vsyncpa [#allocation6], 0 }
   0x3   :  { %12 = vsyncpa [#allocation4], 0 }
   0x4   :  { %14 = vsyncpa [#allocation4 + $0x1], 0  ;;  %s728_s12 = smov 0   ;;  %s730_s13 = smov 0  }
   0x5   :  { %s732_s14 = smov 0   ;;  %s734_s15 = smov 0  }
   0x6 LB: > { %s749_s16 = sadd.s32 4294967295, %s702_s15   ;;  %s462_s17 = sadd.s32 4294967294, %s702_s15   ;;  %s702_s15 = sphi %s734_s15, %s933_s15   ;;  %s698_s14 = sphi %s732_s14, %s932_s14   ;;  %s694_s13 = sphi %s730_s13, %s931_s13   ;;  %s690_s12 = sphi %s728_s12, %s930_s12  }
   0x7   : > { %p40_p0 = scmp.ne.s32.totalorder %s694_s13, %s690_s12  ;;  %p912_p1 = scmp.eq.s32.totalorder %s749_s16, 0 }
   0x8   : > { %p112_p3 = scmp.eq.s32.totalorder %s462_s17, 1  ;;  %p463_p5 = scmp.ge.s32.totalorder %s702_s15, 1 }
   0x9   : > { %p758_p4 = por %p912_p1, %p40_p0  ;;  %p119_p7 = scmp.lt.s32.totalorder %s702_s15, 3 }
   0xa   : > { %p763_p6 = por %p112_p3, %p40_p0  ;;  %s704_s21 = smov [#allocation5]  }
   0xb   : > { %s916_s18 = scalar_select %p758_p4, 1, 0 }
   0xc   : > { %s917_s19 = scalar_select %p763_p6, 1, 0 }
   0xd   : > { %p768_p8 = pnand %p463_p5, %p119_p7  ;;  %s132_s22 = sshll.u32 %s704_s21, 4  ;;  %s133_s22 = int_to_ptr.vmem [resolvable:$true] %s132_s22 }
   0xe   : > { %s705_s23 = smov [#allocation7]   ;;  %s782_s26 = sadd.s32 1, %s702_s15  }
   0xf   : > { %s918_s20 = scalar_select %p768_p8, 1, 0 }
  0x10   : > { %p497_p10 = pneg %p768_p8  ;;  %s143_s24 = sshll.u32 %s705_s23, 4  ;;  %s144_s24 = int_to_ptr.vmem [resolvable:$true] %s143_s24 }
  0x11   : > { %s24_s27 = ssub.s32 %s702_s15, %s782_s26  ;;  %s565_s28 = scalar_lea.vmem %s133_s22, 96 }
  0x12   : > { %p777_p11 = pnand %p497_p10, %p912_p1  ;;  %p566_p13 = scmp.ne.s32.totalorder %s133_s22, %s565_s28 }
  0x13   : > { %p573_p5 = scmp.lt.s32.totalorder %s133_s22, %s133_s22  ;;  %p574_p7 = scmp.lt.s32.totalorder %s565_s28, %s565_s28 }
  0x14   : > { %p556_p12 = pneg %p777_p11 }
  0x15   : > { %p575_p10 = por %p574_p7, %p573_p5 }
  0x16   : > { %p568_p0 = pnand %p566_p13, %p556_p12 }
  0x18   : > { %p569_p3 = pneg %p568_p0 }
  0x1a   : > { %p576_p9 = pnand %p575_p10, %p569_p3 }
  0x1c   : > { %579 = shalt.err (!%p576_p9)
}
  0x1d   : > { %500 = dma.hbm_to_vmem [thread:$0]  (!%p777_p11), %s909_s1, 96, %s133_s22, [#allocation6]  }
  0x1e   : > { %s591_s4 = scalar_lea.vmem %s144_s24, 96  ;;  %p599_p13 = scmp.lt.s32.totalorder %s144_s24, %s144_s24 }
  0x1f   : > { %p592_p1 = scmp.ne.s32.totalorder %s144_s24, %s591_s4  ;;  %p600_p0 = scmp.lt.s32.totalorder %s591_s4, %s591_s4 }
  0x21   : > { %p594_p2 = pnand %p592_p1, %p556_p12  ;;  %p601_p4 = por %p600_p0, %p599_p13 }
  0x23   : > { %p595_p6 = pneg %p594_p2 }
  0x25   : > { %p602_p8 = pnand %p601_p4, %p595_p6 }
  0x27   : > { %605 = shalt.err (!%p602_p8)
}
  0x28   : > { %503 = dma.hbm_to_vmem [thread:$0]  (!%p777_p11), %s910_s2, 96, %s144_s24, [#allocation6]  }
  0x29   : > { %p25_p1 = scmp.eq.s32.totalorder %s24_s27, 0  ;;  %s27_s7 = sadd.s32 1, %s698_s14 }
  0x2a   : > { %p34_p2 = scmp.ne.s32.totalorder %s698_s14, %s694_s13  ;;  %p35_p4 = scmp.eq.s32.totalorder %s702_s15, 0 }
  0x2b   : > { %s809_s8 = scalar_select %p25_p1, %s698_s14, %s27_s7  }
  0x2c   : > { %p36_p6 = por %p35_p4, %p34_p2  ;;  %p920_p8 = scmp.eq.s32.totalorder %s749_s16, 1 }
  0x2d   : > { %p514_p12 = scmp.lt.s32.totalorder %s702_s15, 2  ;;  %s154_s10 = sand.u32 1, %s698_s14  }
  0x2e   : > { %p813_p9 = por %p920_p8, %p34_p2  ;;  %s480_s11 = smul.u32 48, %s154_s10 }
  0x2f   : > { %s481_s17 = smul.u32 768, %s702_s15  ;;  %p820_p3 = pnand %p514_p12, %p36_p6 }
  0x30   : > { %s921_s9 = scalar_select %p813_p9, 1, 0 }
  0x31   : > { %s827_s24 = scalar_lea.hbm %s908_s0, %s481_s17  ;;  %s158_s25 = scalar_lea.vmem [#allocation2], %s480_s11 }
  0x32   : > { %s166_s27 = sshll.u32 %s158_s25, 4  ;;  %s155_s28 = scalar_lea.sflag [#allocation3], %s154_s10  ;;  %s167_s27 = int_to_ptr.vmem [resolvable:$true] %s166_s27 }
  0x33   : > { %s606_s29 = scalar_lea.hbm %s827_s24, 768  ;;  %p608_p5 = pneg %p820_p3 }
  0x34   : > { %p607_p11 = scmp.ne.s32.totalorder %s827_s24, %s606_s29  ;;  %s611_s5 = scalar_lea.hbm %s908_s0, 1536 }
  0x35   : > { %p612_p13 = scmp.lt.s32.totalorder %s827_s24, %s908_s0  ;;  %p613_p0 = scmp.lt.s32.totalorder %s611_s5, %s606_s29 }
  0x36   : > { %p609_p7 = pnand %p608_p5, %p607_p11 }
  0x37   : > { %p614_p1 = por %p613_p0, %p612_p13 }
  0x38   : > { %p610_p10 = pneg %p609_p7 }
  0x3a   : > { %p615_p2 = pnand %p614_p1, %p610_p10 }
  0x3c   : > { %618 = shalt.err (!%p615_p2)
}
  0x3d   : > { %s619_s11 = scalar_lea.vmem %s167_s27, 768  ;;  %s706_s10 = smov [#allocation2]  }
  0x3e   : > { %p620_p4 = scmp.ne.s32.totalorder %s167_s27, %s619_s11  ;;  %s624_s17 = sshll.u32 %s706_s10, 4  ;;  %s625_s17 = int_to_ptr.vmem [resolvable:$false] %s624_s17 }
  0x3f   : > { %s626_s22 = scalar_lea.vmem %s625_s17, 1536  ;;  %p627_p12 = scmp.lt.s32.totalorder %s167_s27, %s625_s17 }
  0x40   : > { %p622_p6 = pnand %p620_p4, %p608_p5  ;;  %p628_p11 = scmp.lt.s32.totalorder %s626_s22, %s619_s11 }
  0x42   : > { %p623_p8 = pneg %p622_p6  ;;  %p629_p7 = por %p628_p11, %p627_p12 }
  0x44   : > { %p630_p9 = pnand %p629_p7, %p623_p8 }
  0x46   : > { %633 = shalt.err (!%p630_p9)
}
  0x47   : > { %507 = dma.hbm_to_vmem [thread:$0]  (!%p820_p3), %s827_s24, 768, %s167_s27, %s155_s28  }
  0x48   : > { %p923_p10 = scmp.ne.s32.totalorder %s918_s20, 0 }
  0x49   : > { %s846_s23 = sand.u32 (!%p923_p10), 1, %s694_s13   ;;  %p924_p5 = scmp.ne.s32.totalorder (!%p923_p10), %s916_s18, 0 }
  0x4a   : > { %175 = sbr.rel (%p923_p10) target bundleno = 426 (0x1aa), region = 32  ;;  %s178_s29 = scalar_lea.sflag (!%p923_p10), [#allocation3], %s846_s23 }
  0x4b   : > { %s482_s25 = smul.u32 (!%p923_p10), 48, %s846_s23 }
  0x4d   : > { %s181_s30 = scalar_lea.vmem (!%p923_p10), [#allocation2], %s482_s25 }
  0x4f   : > { %677 = dma.done.wait (%p924_p5), %s178_s29, 768  }
  0x50   : > { %679 = vsyncadd (%p924_p5), %s178_s29, 4294966528  ;;  %p925_p9 = scmp.eq.s32.totalorder %s749_s16, 0 }
  0x52   : > { %681 = dma.done.wait (%p925_p9), [#allocation6], 192   ;;  %p926_p3 = pmov %p925_p9 }
  0x53   : > { %v212_v0 = vld [vmem:[%s181_s30] sm:$0xff]  ;;  %v213_v1 = vld [vmem:[%s181_s30 + $0x8] sm:$0xff]  ;;  %v214_v2 = vld [vmem:[%s181_s30 + $0x10] sm:$0xff]  ;;  %v257_v33 = vlaneseq  ;;  %s483_s18 = smul.u32 24, %s846_s23  ;;  %p927_p0 = scmp.ne.s32.totalorder %s921_s9, 0 }
  0x54   : > { %683 = vsyncadd (%p926_p3), [#allocation6], 4294967104  ;;  %v218_v3 = vadd.f32 %v213_v1, %v212_v0  ;;  %v215_v4 = vld [vmem:[%s181_s30 + $0x18] sm:$0xff]  ;;  %v216_v6 = vld [vmem:[%s181_s30 + $0x20] sm:$0xff]  ;;  %s484_s20 = smul.u32 384, %s749_s16  ;;  %s359_s16 = scalar_lea.sflag [#allocation4], %s846_s23 }
  0x55   : > { %v217_v8 = vld [vmem:[%s181_s30 + $0x28] sm:$0xff]  ;;  %v258_v34 = vshrl.u32 %v257_v33, 7  ;;  %v255_v37 = vld [vmem:[#allocation5] sm:$0x3f]  ;;  %s211_s21 = scalar_lea.vmem [#allocation8], %s483_s18  ;;  %s707_s6 = smov [#allocation8]  }
  0x56   : > { %v219_v5 = vadd.f32 %v218_v3, %v214_v2  ;;  %v293_v42 = vld [vmem:[#allocation7] sm:$0x3f]  ;;  %s373_s24 = sshll.u32 %s211_s21, 4  ;;  %s865_s4 = scalar_lea.hbm %s911_s3, %s484_s20  ;;  %s867_s24 = int_to_ptr.vmem [resolvable:$true] %s373_s24 }
  0x57   : > { %v259_v35 = vsub.s32 0, %v258_v34  ;;  %v263_v36 = vsub.s32 1, %v258_v34  ;;  %v267_v38 = vsub.s32 2, %v258_v34  ;;  %v271_v39 = vsub.s32 3, %v258_v34  ;;  %s634_s5 = scalar_lea.vmem %s867_s24, 384  ;;  %s638_s7 = sshll.u32 %s707_s6, 4  ;;  %s639_s7 = int_to_ptr.vmem [resolvable:$false] %s638_s7 }
  0x58   : > { %v220_v7 = vadd.f32 %v219_v5, %v215_v4  ;;  %v275_v40 = vsub.s32 4, %v258_v34  ;;  %v279_v41 = vsub.s32 5, %v258_v34  ;;  %p635_p13 = scmp.ne.s32.totalorder %s867_s24, %s634_s5  ;;  %s640_s11 = scalar_lea.vmem %s639_s7, 768 }
  0x59   : > { %v260_v43 = vrot.slane %v255_v37, %v259_v35  ;;  %v264_v44 = vrot.slane %v255_v37, %v263_v36  ;;  %v268_v45 = vrot.slane %v255_v37, %v267_v38  ;;  %v272_v46 = vrot.slane %v255_v37, %v271_v39  ;;  %p641_p4 = scmp.lt.s32.totalorder %s867_s24, %s639_s7  ;;  %p642_p6 = scmp.lt.s32.totalorder %s640_s11, %s634_s5 }
  0x5a   : > { %v221_v9 = vadd.f32 %v220_v7, %v216_v6  ;;  %v276_v47 = vrot.slane %v255_v37, %v275_v40  ;;  %v280_v48 = vrot.slane %v255_v37, %v279_v41  ;;  %v298_v50 = vrot.slane %v293_v42, %v259_v35  ;;  %p636_p1 = pnand %p635_p13, %p927_p0 }
  0x5b   : > { %v302_v51 = vrot.slane %v293_v42, %v263_v36  ;;  %v306_v52 = vrot.slane %v293_v42, %v267_v38  ;;  %v310_v53 = vrot.slane %v293_v42, %v271_v39  ;;  %v314_v60 = vrot.slane %v293_v42, %v275_v40  ;;  %p643_p8 = por %p642_p6, %p641_p4 }
  0x5c   : > { %v222_v10 = vadd.f32 %v221_v9, %v217_v8  ;;  %v318_v61 = vrot.slane %v293_v42, %v279_v41  ;;  %p637_p2 = pneg %p636_p1 }
  0x5e   : > { %223 = vadd.xlane.f32.xlu0 %v222_v10  ;;  %p644_p12 = pnand %p643_p8, %p637_p2 }
  0xe7   : > { %v224_v11 = vpop.xlane.xlu0 %223 }
  0xe8   : > { %v226_v12 = vmul.f32 0.0013020834, %v224_v11 }
  0xea   : > { %v227_v13 = vsub.f32 %v212_v0, %v226_v12  ;;  %v228_v14 = vsub.f32 %v213_v1, %v226_v12  ;;  %v229_v15 = vsub.f32 %v214_v2, %v226_v12  ;;  %v230_v16 = vsub.f32 %v215_v4, %v226_v12 }
  0xeb   : > { %v231_v19 = vsub.f32 %v216_v6, %v226_v12  ;;  %v232_v22 = vsub.f32 %v217_v8, %v226_v12 }
  0xec   : > { %v233_v17 = vmul.f32 %v227_v13, %v227_v13  ;;  %v234_v18 = vmul.f32 %v228_v14, %v228_v14  ;;  %v235_v20 = vmul.f32 %v229_v15, %v229_v15  ;;  %v236_v23 = vmul.f32 %v230_v16, %v230_v16 }
  0xed   : > { %v237_v25 = vmul.f32 %v231_v19, %v231_v19  ;;  %v238_v27 = vmul.f32 %v232_v22, %v232_v22 }
  0xee   : > { %v239_v21 = vadd.f32 %v234_v18, %v233_v17 }
  0xf0   : > { %v240_v24 = vadd.f32 %v239_v21, %v235_v20 }
  0xf2   : > { %v241_v26 = vadd.f32 %v240_v24, %v236_v23 }
  0xf4   : > { %v242_v28 = vadd.f32 %v241_v26, %v237_v25 }
  0xf6   : > { %v243_v29 = vadd.f32 %v242_v28, %v238_v27 }
  0xf8   : > { %244 = vadd.xlane.f32.xlu0 %v243_v29 }
 0x181   : > { %v245_v30 = vpop.xlane.xlu0 %244 }
 0x182   : > { %v246_v31 = vmul.f32 0.0013020834, %v245_v30 }
 0x184   : > { %v247_v32 = vadd.f32 1e-12, %v246_v31 }
 0x186   : > { %552 = vrsqrt.f32 %v247_v32 }
 0x193   : > { %v553_v49 = vpop.eup %552 }
 0x194   : > { %v249_v54 = vmul.f32 %v553_v49, %v227_v13  ;;  %v250_v55 = vmul.f32 %v553_v49, %v228_v14  ;;  %v251_v56 = vmul.f32 %v553_v49, %v229_v15  ;;  %v252_v57 = vmul.f32 %v553_v49, %v230_v16 }
 0x195   : > { %v253_v58 = vmul.f32 %v553_v49, %v231_v19  ;;  %v254_v59 = vmul.f32 %v553_v49, %v232_v22 }
 0x196   : > { %v287_v62 = vmul.f32 %v260_v43, %v249_v54  ;;  %v288_v63 = vmul.f32 %v264_v44, %v250_v55  ;;  %v289_v0 = vmul.f32 %v268_v45, %v251_v56  ;;  %v290_v1 = vmul.f32 %v272_v46, %v252_v57 }
 0x197   : > { %v291_v2 = vmul.f32 %v276_v47, %v253_v58  ;;  %v292_v3 = vmul.f32 %v280_v48, %v254_v59 }
 0x198   : > { %v325_v4 = vadd.f32 %v298_v50, %v287_v62  ;;  %v326_v5 = vadd.f32 %v302_v51, %v288_v63  ;;  %v327_v6 = vadd.f32 %v306_v52, %v289_v0  ;;  %v328_v7 = vadd.f32 %v310_v53, %v290_v1 }
 0x199   : > { %v329_v8 = vadd.f32 %v314_v60, %v291_v2  ;;  %v330_v9 = vadd.f32 %v318_v61, %v292_v3 }
 0x19a   : > { %v477_v10 = vpack.c.bf16 %v326_v5, %v325_v4  ;;  %v478_v11 = vpack.c.bf16 %v328_v7, %v327_v6 }
 0x19b   : > { %v479_v12 = vpack.c.bf16 %v330_v9, %v329_v8 }
 0x19c   : > { %355 = vst [vmem:[%s211_s21] sm:$0xff] %v477_v10  ;;  %356 = vst [vmem:[%s211_s21 + $0x8] sm:$0xff] %v478_v11 }
 0x19d   : > { %357 = vst [vmem:[%s211_s21 + $0x10] sm:$0xff] %v479_v12 }
 0x19e   : > { %647 = shalt.err (!%p644_p12)
}
 0x19f   : > { %s648_s10 = scalar_lea.hbm %s865_s4, 384  ;;  %s652_s23 = scalar_lea.hbm %s911_s3, 768 }
 0x1a0   : > { %p649_p11 = scmp.ne.s32.totalorder %s865_s4, %s648_s10  ;;  %p653_p5 = scmp.lt.s32.totalorder %s865_s4, %s911_s3 }
 0x1a1   : > { %p654_p9 = scmp.lt.s32.totalorder %s652_s23, %s648_s10 }
 0x1a2   : > { %p650_p7 = pnand %p649_p11, %p927_p0 }
 0x1a3   : > { %p655_p3 = por %p654_p9, %p653_p5 }
 0x1a4   : > { %p651_p10 = pneg %p650_p7 }
 0x1a6   : > { %p656_p13 = pnand %p655_p3, %p651_p10 }
 0x1a8   : > { %659 = shalt.err (!%p656_p13)
}
 0x1a9   : > { %495 = dma.vmem_to_hbm [thread:$0]  (%p927_p0), %s867_s24, 384, %s865_s4, %s359_s16  }
 0x1aa PF: > { %s385_s30 = sand.u32 1, %s690_s12   ;;  %p928_p1 = scmp.ne.s32.totalorder %s917_s19, 0 }
 0x1ab   : > { %p929_p2 = scmp.ge.s32.totalorder %s702_s15, 2  ;;  %s386_s18 = scalar_lea.sflag [#allocation4], %s385_s30 }
 0x1ad   : > { %p509_p4 = pnand %p929_p2, %p928_p1 }
 0x1af   : > { %p510_p6 = pneg %p509_p4 }
 0x1b1   : > { %685 = dma.done.wait (%p510_p6), %s386_s18, 384  }
 0x1b2   : > { %687 = vsyncadd (%p510_p6), %s386_s18, 4294966912  ;;  %p17_p8 = scmp.ge.s32.totalorder %s782_s26, 4   ;;  %s930_s12 = smov %s694_s13 }
 0x1b3   : > { %s931_s13 = smov %s698_s14  ;;  %s932_s14 = smov %s809_s8 }
 0x1b4   : > { %s933_s15 = smov %s782_s26  ;;  %19 = sbr.rel (!%p17_p8) target bundleno = 6 (0x6), region = 85 }
 0x1b9   :  { %391 = vsyncpa [#allocation3], 1 }
 0x1ba   :  { %393 = vsyncpa [#allocation3 + $0x1], 1 }
 0x1bb   :  { %394 = vsyncpa [#allocation6], 1 }
 0x1bc   :  { %395 = vsyncpa [#allocation4], 1 }
 0x1bd   :  { %397 = vsyncpa [#allocation4 + $0x1], 1 }

</bundles_post_ra>
